<compile_context>
chip_gen: v7x
topology: tpu7x:2x2x1
jax: 0.10.0
libtpu: 0.0.40
codegen_flags: <defaults>
</compile_context>

<pallas_src>
import functools

import jax
import jax.numpy as jnp
from jax.experimental import pallas as pl
from jax.experimental.pallas import tpu as pltpu

_LANE = 128
_SUBLANE = 8


def _cdiv(a, b):
    return -(-a // b)


def _round_up(a, b):
    return _cdiv(a, b) * b


def _iou_kernel_single(pred_ref, label_ref, out_ref):
    """Small-problem fast path: whole problem in one block, no accumulators/phases."""
    p = pred_ref[...].astype(jnp.float32)        # (B, R, 128)
    l = label_ref[...].astype(jnp.float32)
    inter = jnp.sum(jnp.sum(p * l, axis=-1), axis=-1, keepdims=True)      # (B, 1)
    total = jnp.sum(jnp.sum(p * p + l, axis=-1), axis=-1, keepdims=True)  # (B, 1)
    unit = total - inter
    loss = jnp.mean(1.0 - inter / (unit + 1e-10))
    out_ref[...] = jnp.full_like(out_ref, loss)


def _iou_kernel_tiled(pred_ref, label_ref, out_ref, inter_acc, unit_acc):
    k = pl.program_id(0)

    @pl.when(k == 0)
    def _():
        inter_acc[...] = jnp.zeros_like(inter_acc)
        unit_acc[...] = jnp.zeros_like(unit_acc)

    p = pred_ref[...].astype(jnp.float32)        # (B, R, 128), fully packed vregs
    l = label_ref[...].astype(jnp.float32)

    # Pure elementwise (VPU-only) accumulation per grid step.  The cross-lane /
    # cross-sublane reduction is deferred to the final step, so the steady state
    # has no per-step XLU work and no narrow masked stores -> the HBM DMA stays
    # the only limiter.
    inter_acc[...] += p * l
    unit_acc[...] += p * p + l

    @pl.when(k == pl.num_programs(0) - 1)
    def _():
        inter = jnp.sum(jnp.sum(inter_acc[...], axis=-1), axis=-1, keepdims=True)  # (B, 1)
        total = jnp.sum(jnp.sum(unit_acc[...], axis=-1), axis=-1, keepdims=True)   # (B, 1)
        unit = total - inter
        loss = jnp.mean(1.0 - inter / (unit + 1e-10))
        out_ref[...] = jnp.full_like(out_ref, loss)


@functools.partial(jax.jit, static_argnames=("vmem_budget_bytes",))
def cls_iou_loss(pred, label, vmem_budget_bytes=8 * 1024 * 1024):
    """Pallas TPU implementation of cls_IOUloss.forward. Returns a scalar f32."""
    b = pred.shape[0]
    # Keep native dtype: the DMA moves bf16/f16 inputs at half the bytes and the
    # kernel casts per-tile (no wrapper-side f32 materialization).
    pred2 = pred.reshape(b, -1)
    label2 = label.reshape(b, -1)
    n = pred2.shape[1]

    # View each batch row as (M, 128).
    m = _cdiv(n, _LANE)
    m8 = _round_up(m, _SUBLANE)

    # Per-step chunk height R (sublane rows, multiple of 8): as large as a
    # conservative VMEM budget allows (2 inputs x 2 pipeline buffers + 2 f32
    # accumulators), capped at 512 rows (64K elems/row) where the per-step DMA
    # overhead is already fully amortized.  The 8 MiB budget keeps us well under
    # the v5e 16 MiB and v7x 32 MiB scoped-VMEM defaults.
    itemsize = max(jnp.dtype(pred2.dtype).itemsize, jnp.dtype(label2.dtype).itemsize)
    bytes_per_row = b * _LANE * (4 * itemsize + 2 * 4)
    r_budget = max(_SUBLANE, (vmem_budget_bytes // bytes_per_row) // _SUBLANE * _SUBLANE)
    r_max = min(m8, r_budget, 512)

    num_chunks = _cdiv(m8, r_max)
    r = _round_up(_cdiv(m8, num_chunks), _SUBLANE)
    m_pad = num_chunks * r
    n_pad = m_pad * _LANE

    # Zero padding (only when actually needed) is exact: pred=0, label=0
    # contributes 0 to both the intersection and the union sums.
    if n_pad != n:
        pred2 = jnp.pad(pred2, ((0, 0), (0, n_pad - n)))
        label2 = jnp.pad(label2, ((0, 0), (0, n_pad - n)))
    pred3 = pred2.reshape(b, m_pad, _LANE)
    label3 = label2.reshape(b, m_pad, _LANE)

    if num_chunks == 1:
        kernel = _iou_kernel_single
        scratch_shapes = []
    else:
        kernel = _iou_kernel_tiled
        scratch_shapes = [
            pltpu.VMEM((b, r, _LANE), jnp.float32),
            pltpu.VMEM((b, r, _LANE), jnp.float32),
        ]

    # Note: the shared accumulator requires "arbitrary"; a per-block partial-sum
    # output + "parallel" grid would additionally let v7x's 2nd TensorCore help.
    out = pl.pallas_call(
        kernel,
        out_shape=jax.ShapeDtypeStruct((1, 1), jnp.float32),
        grid_spec=pltpu.PrefetchScalarGridSpec(
            num_scalar_prefetch=0,
            grid=(num_chunks,),
            in_specs=[
                pl.BlockSpec((b, r, _LANE), lambda k: (0, k, 0)),
                pl.BlockSpec((b, r, _LANE), lambda k: (0, k, 0)),
            ],
            out_specs=pl.BlockSpec((1, 1), lambda k: (0, 0)),
            scratch_shapes=scratch_shapes,
        ),
        compiler_params=pltpu.CompilerParams(
            dimension_semantics=("arbitrary",),
        ),
    )(pred3, label3)
    return out[0, 0]


def _reference(pred, label):
    b = pred.shape[0]
    p = pred.reshape(b, -1).astype(jnp.float32)
    l = label.reshape(b, -1).astype(jnp.float32)
    inter = jnp.sum(p * l, axis=-1)
    unit = jnp.sum(p * p + l, axis=-1) - inter
    return jnp.mean(1.0 - inter / (unit + 1e-10))


if __name__ == "__main__":
    key = jax.random.PRNGKey(0)

    def _check(shape, salt):
        k1, k2 = jax.random.split(jax.random.fold_in(key, salt))
        pred = jax.nn.sigmoid(jax.random.normal(k1, shape, jnp.float32))
        label = (jax.random.uniform(k2, shape) > 0.5).astype(jnp.float32)
        loss = cls_iou_loss(pred, label)
        jax.block_until_ready(loss)
        ref = _reference(pred, label)
        assert jnp.allclose(loss, ref, rtol=1e-4, atol=1e-5), (shape, loss, ref)

    # Primary small NCHW case (single-block fast path, no padding).
    _check((2, 4, 16, 16), 0)
    # Larger case exercising the multi-chunk tiled accumulator path (2 grid steps).
    _check((2, 8, 64, 160), 1)
    # Ragged N (not a multiple of 128) -> exercises the zero-padding path.
    _check((2, 3, 15, 17), 2)

    print("KERNEL_OK")
</pallas_src>

<mosaic_0001>
module attributes {stable_mosaic.version = 11 : i64} {
  func.func @_iou_kernel_single(%arg0: i32, %arg1: memref<2x8x128xf32, #tpu.memory_space<vmem>>, %arg2: memref<2x8x128xf32, #tpu.memory_space<vmem>>, %arg3: memref<1x1xf32, #tpu.memory_space<vmem>>) attributes {dimension_semantics = [#tpu.dimension_semantics<arbitrary>], iteration_bounds = array<i64: 1>, scalar_prefetch = 0 : i64, scratch_operands = 0 : i64, tpu.core_type = #tpu.core_type<tc>, window_params = [{transform_indices = @transform_0, window_bounds = array<i64: 2, 8, 128>}, {transform_indices = @transform_1, window_bounds = array<i64: 2, 8, 128>}, {pipeline_mode = #tpu.pipeline_mode<synchronous>, transform_indices = @transform_2, window_bounds = array<i64: 1, 1>}]} {
    %c0 = arith.constant 0 : index
    %c0_0 = arith.constant 0 : index
    %c0_1 = arith.constant 0 : index
    %0 = vector.load %arg1[%c0, %c0_0, %c0_1] : memref<2x8x128xf32, #tpu.memory_space<vmem>>, vector<2x8x128xf32>
    %c0_2 = arith.constant 0 : index
    %c0_3 = arith.constant 0 : index
    %c0_4 = arith.constant 0 : index
    %1 = vector.load %arg2[%c0_2, %c0_3, %c0_4] : memref<2x8x128xf32, #tpu.memory_space<vmem>>, vector<2x8x128xf32>
    %2 = arith.mulf %0, %1 : vector<2x8x128xf32>
    %cst = arith.constant dense<0.000000e+00> : vector<2x8xf32>
    %3 = vector.multi_reduction <add>, %2, %cst [2] : vector<2x8x128xf32> to vector<2x8xf32>
    %cst_5 = arith.constant dense<0.000000e+00> : vector<2xf32>
    %4 = vector.multi_reduction <add>, %3, %cst_5 [1] : vector<2x8xf32> to vector<2xf32>
    %5 = vector.shape_cast %4 : vector<2xf32> to vector<2x1xf32>
    %6 = arith.mulf %0, %0 : vector<2x8x128xf32>
    %7 = arith.addf %6, %1 : vector<2x8x128xf32>
    %cst_6 = arith.constant dense<0.000000e+00> : vector<2x8xf32>
    %8 = vector.multi_reduction <add>, %7, %cst_6 [2] : vector<2x8x128xf32> to vector<2x8xf32>
    %cst_7 = arith.constant dense<0.000000e+00> : vector<2xf32>
    %9 = vector.multi_reduction <add>, %8, %cst_7 [1] : vector<2x8xf32> to vector<2xf32>
    %10 = vector.shape_cast %9 : vector<2xf32> to vector<2x1xf32>
    %11 = arith.subf %10, %5 : vector<2x1xf32>
    %cst_8 = arith.constant 1.000000e-10 : f32
    %12 = vector.broadcast %cst_8 : f32 to vector<2x1xf32>
    %13 = arith.addf %11, %12 : vector<2x1xf32>
    %14 = arith.divf %5, %13 : vector<2x1xf32>
    %cst_9 = arith.constant 1.000000e+00 : f32
    %15 = vector.broadcast %cst_9 : f32 to vector<2x1xf32>
    %16 = arith.subf %15, %14 : vector<2x1xf32>
    %17 = vector.shape_cast %16 : vector<2x1xf32> to vector<1x2x1xf32>
    %cst_10 = arith.constant dense<0.000000e+00> : vector<1xf32>
    %18 = vector.multi_reduction <add>, %17, %cst_10 [1, 2] : vector<1x2x1xf32> to vector<1xf32>
    %19 = vector.shape_cast %18 : vector<1xf32> to vector<1x1x1xf32>
    %20 = vector.extract %19[0, 0, 0] : f32 from vector<1x1x1xf32>
    %cst_11 = arith.constant 2.000000e+00 : f32
    %21 = arith.divf %20, %cst_11 : f32
    %22 = vector.broadcast %21 : f32 to vector<1x1xf32>
    %c0_12 = arith.constant 0 : index
    %c0_13 = arith.constant 0 : index
    %23 = vector.load %arg3[%c0_12, %c0_13] : memref<1x1xf32, #tpu.memory_space<vmem>>, vector<1x1xf32>
    tpu.vector_store %arg3[%c0_12, %c0_13], %22 {strides = array<i32>} : memref<1x1xf32, #tpu.memory_space<vmem>>, vector<1x1xf32>,
    return
  }
  func.func @transform_0(%arg0: i32) -> (i32, i32, i32) {
    %c0_i32 = arith.constant 0 : i32
    %c0_i32_0 = arith.constant 0 : i32
    %c0_i32_1 = arith.constant 0 : i32
    return %c0_i32, %arg0, %c0_i32_0 : i32, i32, i32
  }
  func.func @transform_1(%arg0: i32) -> (i32, i32, i32) {
    %c0_i32 = arith.constant 0 : i32
    %c0_i32_0 = arith.constant 0 : i32
    %c0_i32_1 = arith.constant 0 : i32
    return %c0_i32, %arg0, %c0_i32_0 : i32, i32, i32
  }
  func.func @transform_2(%arg0: i32) -> (i32, i32) {
    %c0_i32 = arith.constant 0 : i32
    %c0_i32_0 = arith.constant 0 : i32
    %c0_i32_1 = arith.constant 0 : i32
    return %c0_i32, %c0_i32_0 : i32, i32
  }
}

</mosaic_0001>

<bundles_post_ra>
// kernel: cls_iou_loss.1
= control target key start
LH: loop header
LB: loop body
LE: loop exit
PB: predicated region body
PF: predicated region fallthrough
CT: control target
= control target key end

     0   :  { %s169_s0 = inlined_call_operand.vmem [shape: f32[2,8,128], index: 0, kind: input, shape index: {}]   ;;  %s170_s1 = inlined_call_operand.vmem [shape: f32[2,8,128], index: 1, kind: input, shape index: {}]   ;;  %s171_s2 = inlined_call_operand.hbm [shape: f32[1,1], index: 2, kind: output, shape index: {}]  }
   0x1   :  { %v12_v0 = vld [vmem:[%s169_s0] sm:$0xff]  ;;  %v13_v2 = vld [vmem:[%s169_s0 + $0x8] sm:$0xff] }
   0x2   :  { %v14_v1 = vld [vmem:[%s170_s1] sm:$0xff]  ;;  %v41_v4 = vmul.f32 %v12_v0, %v12_v0  ;;  %v15_v5 = vld [vmem:[%s170_s1 + $0x8] sm:$0xff]  ;;  %v42_v6 = vmul.f32 %v13_v2, %v13_v2 }
   0x3   :  { %v16_v3 = vmul.f32 %v14_v1, %v12_v0 }
   0x4   :  { %7 = vsyncpa [#allocation3], 0  ;;  %v43_v7 = vadd.f32 %v41_v4, %v14_v1  ;;  %v17_v8 = vmul.f32 %v15_v5, %v13_v2  ;;  %v44_v9 = vadd.f32 %v42_v6, %v15_v5  ;;  %v24_v10 = vlaneseq  ;;  %s129_s0 = smov [#allocation2]  }
   0x5   :  { %18 = vadd.xlane.f32.xlu0 %v16_v3  ;;  %vm34_vm0 = vcmask 1041409   ;;  %vm37_vm1 = vcmask 58368   ;;  %vm69_vm2 = vcmask 1024   ;;  %s92_s1 = sshll.u32 %s129_s0, 4  ;;  %vm84_vm3 = vcmask 0   ;;  %s93_s1 = int_to_ptr.vmem [resolvable:$true] %s92_s1 }
   0x6   :  { %45 = vadd.xlane.f32.xlu1 %v43_v7  ;;  %v25_v11 = vand.u32 127, %v24_v10  ;;  %v27_v12 = vshrl.u32 %v24_v10, 7  ;;  %s105_s19 = scalar_lea.vmem %s93_s1, 16  ;;  %s109_s20 = scalar_lea.vmem %s93_s1, 32 }
   0x7   :  { %p106_p0 = scmp.ne.s32.totalorder %s93_s1, %s105_s19  ;;  %p110_p1 = scmp.lt.s32.totalorder %s93_s1, %s93_s1 }
   0x8   :  { %v28_v14 = vsub.s32 %v25_v11, %v27_v12  ;;  %p111_p2 = scmp.lt.s32.totalorder %s109_s20, %s105_s19 }
   0x9   :  { %20 = vadd.xlane.f32.xlu0 %v17_v8 }
   0xa   :  { %47 = vadd.xlane.f32.xlu1 %v44_v9  ;;  %p112_p3 = por %p111_p2, %p110_p1 }
   0xc   :  { %p113_p4 = pnand %p112_p3, %p106_p0 }
  0x92   :  { %v19_v13 = vpop.xlane.xlu0 %18 }
  0x93   :  { %v46_v15 = vpop.xlane.xlu1 %45  ;;  %v29_v17 = vrot.slane %v19_v13, %v28_v14 }
  0x94   :  { %v54_v20 = vrot.slane %v46_v15, %v28_v14 }
  0x96   :  { %v21_v16 = vpop.xlane.xlu0 %20 }
  0x97   :  { %v33_v18 = vrot.slane %v21_v16, %v28_v14  ;;  %v48_v19 = vpop.xlane.xlu1 %47 }
  0x98   :  { %v58_v21 = vrot.slane %v48_v19, %v28_v14 }
  0x99   :  { %v35_v22 = vsel %vm34_vm0, %v33_v18, %v29_v17 }
  0x9a   :  { %v38_v23 = vsel %vm37_vm1, %v35_v22, 0.0  ;;  %v59_v24 = vsel %vm34_vm0, %v58_v21, %v54_v20 }
  0x9b   :  { %39 = vadd.xlane.f32.xlu0 %v38_v23  ;;  %v61_v25 = vsel %vm37_vm1, %v59_v24, 0.0 }
  0x9c   :  { %62 = vadd.xlane.f32.xlu1 %v61_v25 }
 0x128   :  { %v40_v26 = vpop.xlane.xlu0 %39 }
 0x129   :  { %v63_v27 = vpop.xlane.xlu1 %62 }
 0x12a   :  { %v64_v28 = vsub.f32 %v63_v27, %v40_v26 }
 0x12c   :  { %v65_v29 = vadd.f32 1e-10, %v64_v28 }
 0x12e   :  { %103 = vrcp.f32 %v65_v29 }
 0x138   :  { %v104_v30 = vpop.eup %103 }
 0x139   :  { %v67_v31 = vmul.f32 %v104_v30, %v40_v26 }
 0x13b   :  { %v68_v32 = vsub.f32 1.0, %v67_v31 }
 0x13d   :  { %v70_v33 = vsel %vm69_vm2, %v68_v32, 0.0 }
 0x13e   :  { %71 = vadd.xlane.f32.xlu0 %v70_v33 }
 0x1cb   :  { %v72_v34 = vpop.xlane.xlu0 %71 }
 0x1cc   :  { %v73_v35 = vrot.slane %v72_v34, 4 }
 0x1ce   :  { %v74_v36 = vadd.f32 %v73_v35, %v72_v34 }
 0x1d0   :  { %v75_v37 = vrot.slane %v74_v36, 2 }
 0x1d2   :  { %v76_v38 = vadd.f32 %v75_v37, %v74_v36 }
 0x1d4   :  { %v77_v39 = vrot.slane %v76_v38, 1 }
 0x1d6   :  { %v78_v40 = vadd.f32 %v77_v39, %v76_v38 }
 0x1d8   :  { %100 = vpush %v78_v40 }
 0x209   :  { %s101_s17 = spop %100 }
 0x20a   :  { %s82_s18 = smul.f32 0.5, %s101_s17 }
 0x20c   :  { %v83_v41 = vstv %s82_s18 }
 0x20d   :  { %85 = vst.msk [vmem:[#allocation2] sm:$0x1] %vm84_vm3, %v83_v41 }
 0x20e   :  { %116 = shalt.err (!%p113_p4)
}
 0x20f   :  { %s117_s23 = scalar_lea.hbm %s171_s2, 16 }
 0x210   :  { %p118_p5 = scmp.ne.s32.totalorder %s171_s2, %s117_s23  ;;  %p121_p6 = scmp.lt.u32.totalorder %s117_s23, %s171_s2 }
 0x212   :  { %p123_p7 = pnand %p121_p6, %p118_p5 }
 0x214   :  { %126 = shalt.err (!%p123_p7)
}
 0x215   :  { %95 = dma.vmem_to_hbm [thread:$0]  %s93_s1, 16, %s171_s2, [#allocation3]  }
 0x216   :  { %127 = dma.done.wait [#allocation3], 16  }
 0x217   :  { %128 = vsyncadd [#allocation3], 4294967280 }
 0x218   :  { %99 = vsyncpa [#allocation3], 1 }

</bundles_post_ra>
